<compile_context>
chip_gen: v6e
topology: v6e:2x2x1
jax: 0.10.0
libtpu: 0.0.40
codegen_flags: <defaults>
</compile_context>

<pallas_src>
import jax
import jax.numpy as jnp
from jax.experimental import pallas as pl
from jax.experimental.pallas import tpu as pltpu


def mlp_kernel(x_ref,
               w1_ref, b1_ref,
               w2_ref, b2_ref,
               w3_ref, b3_ref,
               w4d_ref, b4d_ref,
               o_ref):
    # x_ref: (9, TN); weights (out_p, in_p) bf16; biases (out_p, 1) f32.
    x = x_ref[...].astype(jnp.bfloat16)

    # fc1 + relu   (9 -> 16[=pad(10)])
    h = jnp.dot(w1_ref[...], x, preferred_element_type=jnp.float32) + b1_ref[...]
    h = jnp.maximum(h, 0.0)

    # fc2 + relu   (16 -> 24[=pad(20)]); dropout1 is identity in eval mode
    h = jnp.dot(w2_ref[...], h.astype(jnp.bfloat16),
                preferred_element_type=jnp.float32) + b2_ref[...]
    h = jnp.maximum(h, 0.0)

    # fc3 + relu   (24 -> 16[=pad(10)]); dropout2 is identity in eval mode
    h = jnp.dot(w3_ref[...], h.astype(jnp.bfloat16),
                preferred_element_type=jnp.float32) + b3_ref[...]
    h = jnp.maximum(h, 0.0)

    # fc4 folded with the 2-class softmax: d = (w4_row0 - w4_row1) @ h + (b4_0 - b4_1)
    d = jnp.dot(w4d_ref[...], h.astype(jnp.bfloat16),
                preferred_element_type=jnp.float32) + b4d_ref[...]        # (1, TN)

    # softmax over 2 classes == sigmoid of the logit difference (EUP exp + recip).
    p0 = pl.reciprocal(1.0 + jnp.exp(-d), approx=True)                    # (1, TN)
    o_ref[0:1, :] = p0.astype(o_ref.dtype)
    o_ref[1:2, :] = (1.0 - p0).astype(o_ref.dtype)


def _round_up(n, m):
    return ((n + m - 1) // m) * m


def mymodule2_forward(x, params, *, block_tn=2048, x_is_transposed=False):
    """MyModule2 forward.

    x: (B, 9) float32 or bfloat16 (or (9, B) if x_is_transposed=True, which skips
    the wrapper-side transpose pass when the producer can emit it that way).
    Returns (B, 2) float32 softmax probabilities.
    """
    (w1, b1, w2, b2, w3, b3, w4d, b4d) = params

    if x_is_transposed:
        xt = x
        f_in, B = x.shape
    else:
        B, f_in = x.shape
        xt = x.T  # TODO(synk): have the upstream producer emit (9, B) / bf16 to skip this pass.

    # Batch tile on the lane axis: multiple of 128 (or the full extent when B <= 128),
    # capped so the "parallel" grid keeps >= 2 steps for v7x's two TensorCores.
    if B <= 128:
        tn = B
    else:
        tn = max(128, min(block_tn, _round_up(pl.cdiv(B, 2), 128)))
    grid = (pl.cdiv(B, tn),)

    def resident(a):  # full array, constant block index -> VMEM-resident across tiles
        return pl.BlockSpec(a.shape, lambda i: (0, 0))

    cost = pl.CostEstimate(
        flops=2 * B * (9 * 16 + 16 * 24 + 24 * 16 + 16),
        transcendentals=B,
        bytes_accessed=B * (f_in * x.dtype.itemsize + 2 * 4),
    )

    out_t = pl.pallas_call(
        mlp_kernel,
        out_shape=jax.ShapeDtypeStruct((2, B), jnp.float32),
        grid=grid,
        in_specs=[
            pl.BlockSpec((f_in, tn), lambda i: (0, i)),   # x^T: batch-tiled on lanes
            resident(w1), resident(b1),
            resident(w2), resident(b2),
            resident(w3), resident(b3),
            resident(w4d), resident(b4d),
        ],
        out_specs=pl.BlockSpec((2, tn), lambda i: (0, i)),
        compiler_params=pltpu.CompilerParams(
            dimension_semantics=("parallel",)),
        cost_estimate=cost,
    )(xt, w1, b1, w2, b2, w3, b3, w4d, b4d)

    return out_t.T  # (B, 2); tiny (2 x B) transpose


# Logical layer dims (PyTorch [out, in]) and zero-padded storage dims.
_LOGICAL_DIMS = [(10, 9), (20, 10), (10, 20), (2, 10)]
_PADDED_DIMS = [(16, 9), (24, 16), (16, 24), (2, 16)]


def init_params(key):
    """Mimics weight_init2: normal weights, zero biases.

    Weights stored [out, in] (PyTorch orientation, matches the transposed kernel),
    zero-padded to _PADDED_DIMS and cast to bf16; biases f32, shape (out_p, 1).
    fc4 is folded into a single logit-difference row w4d (1, 16) and scalar b4d.
    NOTE: a real checkpoint loader must keep the padded weight/bias slots exactly
    zero, otherwise padded hidden rows leak into the next layer.
    """
    layers = []
    for (dout, din), (dout_p, din_p) in zip(_LOGICAL_DIMS, _PADDED_DIMS):
        key, wk = jax.random.split(key)
        w = jax.random.normal(wk, (dout, din), dtype=jnp.float32)
        w_p = jnp.zeros((dout_p, din_p), jnp.float32).at[:dout, :din].set(w)
        b_p = jnp.zeros((dout_p, 1), jnp.float32)
        layers.append((w_p, b_p))
    (w1, b1), (w2, b2), (w3, b3), (w4, b4) = layers

    w4d = w4[0:1, :] - w4[1:2, :]     # (1, 16)
    b4d = b4[0:1, :] - b4[1:2, :]     # (1, 1)

    return (w1.astype(jnp.bfloat16), b1,
            w2.astype(jnp.bfloat16), b2,
            w3.astype(jnp.bfloat16), b3,
            w4d.astype(jnp.bfloat16), b4d)


def reference_forward(x, params):
    """Pure-jnp reference using the same (padded, bf16, folded) params."""
    (w1, b1, w2, b2, w3, b3, w4d, b4d) = params

    def layer(h, w, b):
        y = jnp.dot(h.astype(jnp.bfloat16), w.T,
                    preferred_element_type=jnp.float32) + b.T
        return jnp.maximum(y, 0.0)

    h = layer(x, w1, b1)
    h = layer(h, w2, b2)
    h = layer(h, w3, b3)
    d = jnp.dot(h.astype(jnp.bfloat16), w4d.T,
                preferred_element_type=jnp.float32) + b4d      # (B, 1)
    p0 = jax.nn.sigmoid(d)
    return jnp.concatenate([p0, 1.0 - p0], axis=-1)


def _check(out, ref):
    assert out.shape == ref.shape
    assert bool(jnp.all(jnp.isfinite(out)))
    # softmax rows sum to 1 exactly by construction (p1 = 1 - p0)
    assert bool(jnp.allclose(jnp.sum(out, axis=-1), 1.0, atol=1e-5))
    # bf16 matmuls + approx reciprocal -> compare at ~1e-2 vs the bf16 reference
    assert bool(jnp.allclose(out, ref, atol=2e-2)), "kernel/reference mismatch"


if __name__ == "__main__":
    key = jax.random.PRNGKey(0)
    key, xk1, xk2 = jax.random.split(key, 3)
    params = init_params(key)

    # Case 1: tiny batch (single full-extent block, grid of 1).
    B1 = 16
    x1 = jax.random.normal(xk1, (B1, 9), dtype=jnp.float32)
    out1 = jax.block_until_ready(mymodule2_forward(x1, params))
    _check(out1, jax.block_until_ready(reference_forward(x1, params)))

    # Case 2: batch > 128 -> lane-aligned 128-wide tiles, 2 "parallel" grid steps
    # (exercises the v7x dual-TensorCore path; production sweep block_tn 1024-4096).
    B2 = 256
    x2 = jax.random.normal(xk2, (B2, 9), dtype=jnp.float32)
    out2 = jax.block_until_ready(mymodule2_forward(x2, params, block_tn=2048))
    _check(out2, jax.block_until_ready(reference_forward(x2, params)))

    print("KERNEL_OK")
</pallas_src>

<mosaic_0001>
module attributes {stable_mosaic.version = 11 : i64} {
  func.func @mlp_kernel(%arg0: i32, %arg1: memref<9x16xf32, #tpu.memory_space<vmem>>, %arg2: memref<16x9xbf16, #tpu.memory_space<vmem>>, %arg3: memref<16x1xf32, #tpu.memory_space<vmem>>, %arg4: memref<24x16xbf16, #tpu.memory_space<vmem>>, %arg5: memref<24x1xf32, #tpu.memory_space<vmem>>, %arg6: memref<16x24xbf16, #tpu.memory_space<vmem>>, %arg7: memref<16x1xf32, #tpu.memory_space<vmem>>, %arg8: memref<1x16xbf16, #tpu.memory_space<vmem>>, %arg9: memref<1x1xf32, #tpu.memory_space<vmem>>, %arg10: memref<2x16xf32, #tpu.memory_space<vmem>>) attributes {dimension_semantics = [#tpu.dimension_semantics<parallel>], iteration_bounds = array<i64: 1>, scalar_prefetch = 0 : i64, scratch_operands = 0 : i64, tpu.core_type = #tpu.core_type<tc>, window_params = [{transform_indices = @transform_0, window_bounds = array<i64: 9, 16>}, {pipeline_mode = #tpu.pipeline_mode<synchronous>, transform_indices = @transform_1, window_bounds = array<i64: 16, 9>}, {pipeline_mode = #tpu.pipeline_mode<synchronous>, transform_indices = @transform_2, window_bounds = array<i64: 16, 1>}, {pipeline_mode = #tpu.pipeline_mode<synchronous>, transform_indices = @transform_3, window_bounds = array<i64: 24, 16>}, {pipeline_mode = #tpu.pipeline_mode<synchronous>, transform_indices = @transform_4, window_bounds = array<i64: 24, 1>}, {pipeline_mode = #tpu.pipeline_mode<synchronous>, transform_indices = @transform_5, window_bounds = array<i64: 16, 24>}, {pipeline_mode = #tpu.pipeline_mode<synchronous>, transform_indices = @transform_6, window_bounds = array<i64: 16, 1>}, {pipeline_mode = #tpu.pipeline_mode<synchronous>, transform_indices = @transform_7, window_bounds = array<i64: 1, 16>}, {pipeline_mode = #tpu.pipeline_mode<synchronous>, transform_indices = @transform_8, window_bounds = array<i64: 1, 1>}, {transform_indices = @transform_9, window_bounds = array<i64: 2, 16>}]} {
    %c0 = arith.constant 0 : index
    %c0_0 = arith.constant 0 : index
    %0 = vector.load %arg1[%c0, %c0_0] : memref<9x16xf32, #tpu.memory_space<vmem>>, vector<9x16xf32>
    %1 = arith.truncf %0 : vector<9x16xf32> to vector<9x16xbf16>
    %c0_1 = arith.constant 0 : index
    %c0_2 = arith.constant 0 : index
    %2 = vector.load %arg2[%c0_1, %c0_2] : memref<16x9xbf16, #tpu.memory_space<vmem>>, vector<16x9xbf16>
    %cst = arith.constant dense<0.000000e+00> : vector<16x16xf32>
    %3 = tpu.matmul %2, %1, %cst {dimension_numbers = #tpu.dot_dimension_numbers<[1], [0], [0], [1], [0, 0, 1, 1], [], []>} : vector<16x9xbf16>, vector<9x16xbf16>, vector<16x16xf32> -> vector<16x16xf32>
    %c0_3 = arith.constant 0 : index
    %c0_4 = arith.constant 0 : index
    %4 = vector.load %arg3[%c0_3, %c0_4] : memref<16x1xf32, #tpu.memory_space<vmem>>, vector<16x1xf32>
    %5 = vector.broadcast %4 : vector<16x1xf32> to vector<16x16xf32>
    %6 = arith.addf %3, %5 : vector<16x16xf32>
    %cst_5 = arith.constant 0.000000e+00 : f32
    %7 = vector.broadcast %cst_5 : f32 to vector<16x16xf32>
    %8 = arith.maximumf %6, %7 : vector<16x16xf32>
    %c0_6 = arith.constant 0 : index
    %c0_7 = arith.constant 0 : index
    %9 = vector.load %arg4[%c0_6, %c0_7] : memref<24x16xbf16, #tpu.memory_space<vmem>>, vector<24x16xbf16>
    %10 = arith.truncf %8 : vector<16x16xf32> to vector<16x16xbf16>
    %cst_8 = arith.constant dense<0.000000e+00> : vector<24x16xf32>
    %11 = tpu.matmul %9, %10, %cst_8 {dimension_numbers = #tpu.dot_dimension_numbers<[1], [0], [0], [1], [0, 0, 1, 1], [], []>} : vector<24x16xbf16>, vector<16x16xbf16>, vector<24x16xf32> -> vector<24x16xf32>
    %c0_9 = arith.constant 0 : index
    %c0_10 = arith.constant 0 : index
    %12 = vector.load %arg5[%c0_9, %c0_10] : memref<24x1xf32, #tpu.memory_space<vmem>>, vector<24x1xf32>
    %13 = vector.broadcast %12 : vector<24x1xf32> to vector<24x16xf32>
    %14 = arith.addf %11, %13 : vector<24x16xf32>
    %cst_11 = arith.constant 0.000000e+00 : f32
    %15 = vector.broadcast %cst_11 : f32 to vector<24x16xf32>
    %16 = arith.maximumf %14, %15 : vector<24x16xf32>
    %c0_12 = arith.constant 0 : index
    %c0_13 = arith.constant 0 : index
    %17 = vector.load %arg6[%c0_12, %c0_13] : memref<16x24xbf16, #tpu.memory_space<vmem>>, vector<16x24xbf16>
    %18 = arith.truncf %16 : vector<24x16xf32> to vector<24x16xbf16>
    %cst_14 = arith.constant dense<0.000000e+00> : vector<16x16xf32>
    %19 = tpu.matmul %17, %18, %cst_14 {dimension_numbers = #tpu.dot_dimension_numbers<[1], [0], [0], [1], [0, 0, 1, 1], [], []>} : vector<16x24xbf16>, vector<24x16xbf16>, vector<16x16xf32> -> vector<16x16xf32>
    %c0_15 = arith.constant 0 : index
    %c0_16 = arith.constant 0 : index
    %20 = vector.load %arg7[%c0_15, %c0_16] : memref<16x1xf32, #tpu.memory_space<vmem>>, vector<16x1xf32>
    %21 = vector.broadcast %20 : vector<16x1xf32> to vector<16x16xf32>
    %22 = arith.addf %19, %21 : vector<16x16xf32>
    %cst_17 = arith.constant 0.000000e+00 : f32
    %23 = vector.broadcast %cst_17 : f32 to vector<16x16xf32>
    %24 = arith.maximumf %22, %23 : vector<16x16xf32>
    %c0_18 = arith.constant 0 : index
    %c0_19 = arith.constant 0 : index
    %25 = vector.load %arg8[%c0_18, %c0_19] : memref<1x16xbf16, #tpu.memory_space<vmem>>, vector<1x16xbf16>
    %26 = arith.truncf %24 : vector<16x16xf32> to vector<16x16xbf16>
    %cst_20 = arith.constant dense<0.000000e+00> : vector<1x16xf32>
    %27 = tpu.matmul %25, %26, %cst_20 {dimension_numbers = #tpu.dot_dimension_numbers<[1], [0], [0], [1], [0, 0, 1, 1], [], []>} : vector<1x16xbf16>, vector<16x16xbf16>, vector<1x16xf32> -> vector<1x16xf32>
    %c0_21 = arith.constant 0 : index
    %c0_22 = arith.constant 0 : index
    %28 = vector.load %arg9[%c0_21, %c0_22] : memref<1x1xf32, #tpu.memory_space<vmem>>, vector<1x1xf32>
    %29 = vector.broadcast %28 : vector<1x1xf32> to vector<1x16xf32>
    %30 = arith.addf %27, %29 : vector<1x16xf32>
    %cst_23 = arith.constant 0.000000e+00 : f32
    %31 = vector.broadcast %cst_23 : f32 to vector<1x16xf32>
    %32 = arith.subf %31, %30 : vector<1x16xf32>
    %33 = math.exp %32 : vector<1x16xf32>
    %cst_24 = arith.constant 1.000000e+00 : f32
    %34 = vector.broadcast %cst_24 : f32 to vector<1x16xf32>
    %35 = arith.addf %34, %33 : vector<1x16xf32>
    %36 = tpu.reciprocal %35 {approx = true} : vector<1x16xf32> -> vector<1x16xf32>
    %c0_25 = arith.constant 0 : index
    %c0_26 = arith.constant 0 : index
    %37 = vector.load %arg10[%c0_25, %c0_26] : memref<2x16xf32, #tpu.memory_space<vmem>>, vector<1x16xf32>
    tpu.vector_store %arg10[%c0_25, %c0_26], %36 {strides = array<i32>} : memref<2x16xf32, #tpu.memory_space<vmem>>, vector<1x16xf32>,
    %cst_27 = arith.constant 1.000000e+00 : f32
    %38 = vector.broadcast %cst_27 : f32 to vector<1x16xf32>
    %39 = arith.subf %38, %36 : vector<1x16xf32>
    %c1 = arith.constant 1 : index
    %c0_28 = arith.constant 0 : index
    %40 = vector.load %arg10[%c1, %c0_28] : memref<2x16xf32, #tpu.memory_space<vmem>>, vector<1x16xf32>
    tpu.vector_store %arg10[%c1, %c0_28], %39 {strides = array<i32>} : memref<2x16xf32, #tpu.memory_space<vmem>>, vector<1x16xf32>,
    return
  }
  func.func @transform_0(%arg0: i32) -> (i32, i32) {
    %c0_i32 = arith.constant 0 : i32
    %c0_i32_0 = arith.constant 0 : i32
    return %c0_i32, %arg0 : i32, i32
  }
  func.func @transform_1(%arg0: i32) -> (i32, i32) {
    %c0_i32 = arith.constant 0 : i32
    %c0_i32_0 = arith.constant 0 : i32
    %c0_i32_1 = arith.constant 0 : i32
    return %c0_i32, %c0_i32_0 : i32, i32
  }
  func.func @transform_2(%arg0: i32) -> (i32, i32) {
    %c0_i32 = arith.constant 0 : i32
    %c0_i32_0 = arith.constant 0 : i32
    %c0_i32_1 = arith.constant 0 : i32
    return %c0_i32, %c0_i32_0 : i32, i32
  }
  func.func @transform_3(%arg0: i32) -> (i32, i32) {
    %c0_i32 = arith.constant 0 : i32
    %c0_i32_0 = arith.constant 0 : i32
    %c0_i32_1 = arith.constant 0 : i32
    return %c0_i32, %c0_i32_0 : i32, i32
  }
  func.func @transform_4(%arg0: i32) -> (i32, i32) {
    %c0_i32 = arith.constant 0 : i32
    %c0_i32_0 = arith.constant 0 : i32
    %c0_i32_1 = arith.constant 0 : i32
    return %c0_i32, %c0_i32_0 : i32, i32
  }
  func.func @transform_5(%arg0: i32) -> (i32, i32) {
    %c0_i32 = arith.constant 0 : i32
    %c0_i32_0 = arith.constant 0 : i32
    %c0_i32_1 = arith.constant 0 : i32
    return %c0_i32, %c0_i32_0 : i32, i32
  }
  func.func @transform_6(%arg0: i32) -> (i32, i32) {
    %c0_i32 = arith.constant 0 : i32
    %c0_i32_0 = arith.constant 0 : i32
    %c0_i32_1 = arith.constant 0 : i32
    return %c0_i32, %c0_i32_0 : i32, i32
  }
  func.func @transform_7(%arg0: i32) -> (i32, i32) {
    %c0_i32 = arith.constant 0 : i32
    %c0_i32_0 = arith.constant 0 : i32
    %c0_i32_1 = arith.constant 0 : i32
    return %c0_i32, %c0_i32_0 : i32, i32
  }
  func.func @transform_8(%arg0: i32) -> (i32, i32) {
    %c0_i32 = arith.constant 0 : i32
    %c0_i32_0 = arith.constant 0 : i32
    %c0_i32_1 = arith.constant 0 : i32
    return %c0_i32, %c0_i32_0 : i32, i32
  }
  func.func @transform_9(%arg0: i32) -> (i32, i32) {
    %c0_i32 = arith.constant 0 : i32
    %c0_i32_0 = arith.constant 0 : i32
    return %c0_i32, %arg0 : i32, i32
  }
}

</mosaic_0001>

<bundles_post_ra>
// kernel: tpu_custom_call.1
= control target key start
LH: loop header
LB: loop body
LE: loop exit
PB: predicated region body
PF: predicated region fallthrough
CT: control target
= control target key end

     0   :  { %s549_s0 = inlined_call_operand.vmem [shape: f32[9,16], index: 0, kind: input, shape index: {}]   ;;  %s550_s1 = inlined_call_operand.vmem [shape: bf16[16,9], index: 1, kind: input, shape index: {}]   ;;  %s551_s2 = inlined_call_operand.vmem [shape: f32[16,1], index: 2, kind: input, shape index: {}]   ;;  %s552_s3 = inlined_call_operand.vmem [shape: bf16[24,16], index: 3, kind: input, shape index: {}]   ;;  %s553_s4 = inlined_call_operand.vmem [shape: f32[24,1], index: 4, kind: input, shape index: {}]   ;;  %s554_s5 = inlined_call_operand.vmem [shape: bf16[16,24], index: 5, kind: input, shape index: {}]   ;;  %s555_s6 = inlined_call_operand.vmem [shape: f32[16,1], index: 6, kind: input, shape index: {}]   ;;  %s556_s7 = inlined_call_operand.vmem [shape: bf16[1,16], index: 7, kind: input, shape index: {}]   ;;  %s557_s8 = inlined_call_operand.<no memory space> [shape: f32[1,1], index: 8, kind: input, shape index: {}]   ;;  %s558_s9 = inlined_call_operand.hbm [shape: f32[2,16], index: 9, kind: output, shape index: {}]  }
   0x1   :  { %v14_v0 = vstv %s557_s8 }
   0x2   :  { %15 = vst [vmem:[#allocation2] sm:$0x1] %v14_v0 }
   0x3   :  { %v36_v1 = vld [vmem:[%s549_s0] sm:$0xff]  ;;  %v37_v2 = vld [vmem:[%s549_s0 + $0x8] sm:$0x1]  ;;  %vm62_vm0 = vcmask 1043456   ;;  %vm63_vm1 = vcmask 1044480   ;;  %v431_v3 = vmov 0.0  }
   0x4   :  { %368 = vmatprep.subr.bf16.mxu0 %v431_v3  ;;  %v38_v4 = vpack.c.bf16 %v37_v2, %v36_v1  ;;  %v432_v5 = vmov 65535   ;;  %vm433_vm2 = vmmov 0   ;;  %v41_v7 = vld [vmem:[%s551_s2] sm:$0xff]  ;;  %v434_v10 = vmov 0   ;;  %v42_v12 = vld [vmem:[%s551_s2 + $0x8] sm:$0xff] }
   0x5   :  { %v64_v6 = vsel %vm62_vm0, 4294967295, %v432_v5  ;;  %370 = vmatprep.mubr.msk.bf16.mxu0 %vm433_vm2, %v431_v3  ;;  %v401_v9 = vld [vmem:[%s550_s1] sm:$0xff]   ;;  %399 = vset.pattern.permute.xlu0 %v434_v10 }
   0x6   :  { %v65_v8 = vsel %vm63_vm1, %v64_v6, 0  ;;  %400 = vset.pattern.permute.xlu1 %v434_v10  ;;  %45 = vperm.xlu0 %399, %v41_v7  }
   0x7   :  { %v67_v11 = vand.u32 %v65_v8, %v38_v4 }
   0x8   :  { %16 = vsyncpa [#allocation4], 0  ;;  %vm58_vm3 = vcmask 72704   ;;  %v117_v13 = vld [vmem:[%s553_s4 + $0x8] sm:$0xff]  ;;  %v402_v15 = vld [vmem:[%s552_s3] sm:$0xff]   ;;  %vm142_vm4 = vcmask 130048   ;;  %v279_v61 = vlaneseq }
   0x9   :  { %369 = vmatpush3.bf16.msra.mxu0 %v67_v11  ;;  %v205_v14 = vld [vmem:[%s555_s6 + $0x8] sm:$0xff]  ;;  %376 = vmatprep.mubr.msk.bf16.mxu1 %vm142_vm4, %v402_v15  ;;  %v118_v16 = vld [vmem:[%s553_s4 + $0x10] sm:$0xff]  ;;  %v116_v17 = vld [vmem:[%s553_s4] sm:$0xff]  ;;  %vm221_vm5 = vcmask 195584   ;;  %vm331_vm6 = vcmask 122880  }
   0xa   :  { %380 = vmatprep.subr.bf16.mxu0 %v431_v3  ;;  %50 = vperm.xlu0 %399, %v42_v12   ;;  %v204_v18 = vld [vmem:[%s555_s6] sm:$0xff]  ;;  %v403_v31 = vld [vmem:[%s552_s3 + $0x8] ss:$0 sps:$4 sm:$0xff]   ;;  %v280_v62 = vshrl.u32 %v279_v61, 7 }
   0xb   :  { %131 = vperm.xlu1 %400, %v118_v16   ;;  %v273_v19 = vld [vmem:[#allocation2] sm:$0x1] }
   0xc   :  { %371 = vmatmul.mubr.msk.bf16.vlgmr.msra.gmra.mxu0 %vm58_vm3, %v401_v9  ;;  %v404_v48 = vld [vmem:[%s554_s5] sm:$0xff]   ;;  %v281_v63 = vsub.s32 0, %v280_v62  ;;  %s435_s5 = smov [#allocation3]  }
   0xd   :  { %384 = vmatprep.mubr.msk.bf16.mxu0 %vm433_vm2, %v431_v3  ;;  %v271_v60 = vld [vmem:[%s556_s7] sm:$0x1]  ;;  %s341_s7 = sshll.u32 %s435_s5, 4  ;;  %s342_s7 = int_to_ptr.vmem [resolvable:$true] %s341_s7 }
   0xe   :  { %126 = vperm.xlu0 %399, %v117_v13   ;;  %s409_s11 = scalar_lea.vmem %s342_s7, 32  ;;  %p414_p1 = scmp.lt.s32.totalorder %s342_s7, %s342_s7 }
   0xf   :  { %121 = vperm.xlu1 %400, %v116_v17   ;;  %p410_p0 = scmp.ne.s32.totalorder %s342_s7, %s409_s11  ;;  %p415_p2 = scmp.lt.s32.totalorder %s409_s11, %s409_s11 }
  0x11   :  { %p416_p3 = por %p415_p2, %p414_p1 }
  0x12   :  { %213 = vperm.xlu0 %399, %v205_v14  }
  0x13   :  { %208 = vperm.xlu1 %400, %v204_v18   ;;  %p417_p4 = pnand %p416_p3, %p410_p0 }
  0x17   :  { %276 = vperm.xlu1 %400, %v273_v19  }
  0x81   :  { %v46_v20 = vpop.permute.xlu0 %45 }
  0x85   :  { %v51_v24 = vpop.permute.xlu0 %50 }
  0x86   :  { %v132_v32 = vpop.permute.xlu1 %131 }
  0x89   :  { %v127_v41 = vpop.permute.xlu0 %126 }
  0x8a   :  { %v122_v37 = vpop.permute.xlu1 %121 }
  0x8d   :  { %v214_v53 = vpop.permute.xlu0 %213 }
  0x8e   :  { %v209_v50 = vpop.permute.xlu1 %208 }
  0x92   :  { %v277_v0 = vpop.permute.xlu1 %276 }
  0x93   :  { %v282_v1 = vrot.slane %v277_v0, %v281_v63 }
  0xcc   :  { %v103_v21 = vpop.f32.mrf.mxu0 }
  0xcd   :  { %v104_v23 = vadd.f32 %v103_v21, %v46_v20 }
  0xce   :  { %v372_v22 = vpop.f32.mrf.mxu0 }
  0xcf   :  { %v110_v28 = vmax.f32 %v104_v23, 0.0 }
  0xd0   :  { %v106_v25 = vpop.f32.mrf.mxu0 }
  0xd1   :  { %v107_v26 = vadd.f32 %v106_v25, %v51_v24 }
  0xd2   :  { %v373_v27 = vpop.f32.mrf.mxu0 }
  0xd3   :  { %v111_v29 = vmax.f32 %v107_v26, 0.0 }
  0xd5   :  { %v115_v30 = vpack.c.bf16 %v111_v29, %v110_v28 }
  0xd7   :  { %374 = vmatprep.subr.bf16.mxu1 %v115_v30 }
  0xd8   :  { %375 = vmatpush3.bf16.msra.mxu1 %v115_v30 }
  0xd9   :  { %388 = vmatprep.subr.bf16.mxu1 %v431_v3 }
  0xdb   :  { %377 = vmatmul.mubr.msk.bf16.vlgmr.msra.gmra.mxu1 %vm142_vm4, %v403_v31 }
  0xdc   :  { %390 = vmatprep.mubr.msk.bf16.mxu1 %vm433_vm2, %v431_v3 }
 0x19b   :  { %v378_v33 = vpop.f32.mrf.mxu1 }
 0x19c   :  { %v192_v34 = vadd.f32 %v378_v33, %v132_v32 }
 0x19d   :  { %v183_v35 = vpop.f32.mrf.mxu1 }
 0x19e   :  { %v199_v36 = vmax.f32 %v192_v34, 0.0  ;;  %v184_v40 = vadd.f32 %v183_v35, %v122_v37 }
 0x19f   :  { %v379_v38 = vpop.f32.mrf.mxu1 }
 0x1a0   :  { %v203_v39 = vpack.c.bf16 %v199_v36, %v199_v36  ;;  %v197_v45 = vmax.f32 %v184_v40, 0.0 }
 0x1a1   :  { %v186_v42 = vpop.f32.mrf.mxu1 }
 0x1a2   :  { %v187_v43 = vadd.f32 %v186_v42, %v127_v41  ;;  %v226_v44 = vsel %vm62_vm0, %v203_v39, 0 }
 0x1a3   :  { %381 = vmatpush3.bf16.msra.mxu0 %v226_v44 }
 0x1a4   :  { %v198_v46 = vmax.f32 %v187_v43, 0.0  ;;  %382 = vmatprep.subr.bf16.mxu0 %v431_v3 }
 0x1a6   :  { %v202_v47 = vpack.c.bf16 %v198_v46, %v197_v45 }
 0x1a8   :  { %383 = vmatpush3.bf16.msra.mxu0 %v202_v47 }
 0x1ab   :  { %385 = vmatmul.mubr.msk.bf16.vlgmr.msra.gmra.mxu0 %vm221_vm5, %v404_v48 }
 0x26b   :  { %v262_v49 = vpop.f32.mrf.mxu0 }
 0x26c   :  { %v263_v52 = vadd.f32 %v262_v49, %v209_v50 }
 0x26d   :  { %v386_v51 = vpop.f32.mrf.mxu0 }
 0x26e   :  { %v269_v57 = vmax.f32 %v263_v52, 0.0 }
 0x26f   :  { %v265_v54 = vpop.f32.mrf.mxu0 }
 0x270   :  { %v266_v55 = vadd.f32 %v265_v54, %v214_v53 }
 0x271   :  { %v387_v56 = vpop.f32.mrf.mxu0 }
 0x272   :  { %v270_v58 = vmax.f32 %v266_v55, 0.0 }
 0x274   :  { %v272_v59 = vpack.c.bf16 %v270_v58, %v269_v57 }
 0x276   :  { %389 = vmatpush3.bf16.msra.mxu1 %v272_v59 }
 0x279   :  { %391 = vmatmul.mubr.msk.bf16.vlgmr.msra.gmra.mxu1 %vm142_vm4, %v271_v60 }
 0x339   :  { %v320_v2 = vpop.f32.mrf.mxu1 }
 0x33a   :  { %v321_v3 = vadd.f32 %v320_v2, %v282_v1 }
 0x33b   :  { %v392_v4 = vpop.f32.mrf.mxu1 }
 0x33c   :  { %v326_v5 = vsub.f32 0.0, %v321_v3 }
 0x33d   :  { %v323_v6 = vpop.f32.mrf.mxu1 }
 0x33e   :  { %v327_v7 = vmul.f32 1.442695, %v326_v5 }
 0x33f   :  { %v393_v8 = vpop.f32.mrf.mxu1 }
 0x340   :  { %405 = vpow2.f32 %v327_v7 }
 0x34d   :  { %v406_v9 = vpop.eup %405 }
 0x34e   :  { %v329_v10 = vadd.f32 1.0, %v406_v9 }
 0x350   :  { %407 = vrcp.f32 %v329_v10 }
 0x35d   :  { %v408_v11 = vpop.eup %407 }
 0x35e   :  { %332 = vst.msk [vmem:[#allocation3] sm:$0x1] %vm331_vm6, %v408_v11  ;;  %v333_v12 = vsub.f32 1.0, %v408_v11 }
 0x360   :  { %334 = vst.msk [vmem:[#allocation3 + $0x1] sm:$0x1] %vm331_vm6, %v333_v12 }
 0x361   :  { %420 = shalt.err (!%p417_p4)
}
 0x362   :  { %344 = dma.vmem_to_hbm [thread:$0]  %s342_s7, 32, %s558_s9, [#allocation4]  }
 0x363   :  { %429 = dma.done.wait [#allocation4], 32  }
 0x364   :  { %430 = vsyncadd [#allocation4], 4294967264 }
 0x365   :  { %348 = vsyncpa [#allocation4], 1 }

</bundles_post_ra>
